<compile_context>
chip_gen: v7x
topology: tpu7x:2x2x1
jax: 0.10.0
libtpu: 0.0.40
codegen_flags: <defaults>
</compile_context>

<pallas_src>
import jax
import jax.numpy as jnp
from jax.experimental import pallas as pl
from jax.experimental.pallas import tpu as pltpu

GENERATOR_PARAM = 100
LEAK_FACTOR = 0.2
VOCAB_SIZE = 2000

H_PAD = 128   # hidden 100 -> 128 (lane-dense, clean (8,128) tiles / MXU N)


def _round_up(n, m):
    return ((n + m - 1) // m) * m


def _tb_max_for_device():
    """Largest batch tile that fits the default scoped-VMEM budget:
    2 x (TB, 2000) f32 x-buffers + in-kernel bf16 cast copy + resident weights."""
    try:
        kind = jax.devices()[0].device_kind.lower()
    except Exception:
        kind = ""
    if "v4" in kind or "v5" in kind:
        return 512     # ~16 MiB default scoped VMEM
    return 1024        # v6e / v7x: ~32 MiB default scoped VMEM


def _pick_tb(batch, tb_max):
    if batch <= 8:
        return 8
    # Aim for >=2 grid steps (keeps both v7x TensorCores fed, overlaps DMA) and
    # keep the recomputed tail small for awkward batch sizes (no 2x padding).
    tb = _round_up((batch + 1) // 2, 8)
    return max(8, min(tb_max, tb))


def _disc_kernel(x_ref, w1_ref, b1_ref, w2_ref, b2_ref, o_ref):
    # Cast the streamed x tile to bf16 in-kernel (no-op if x arrives bf16);
    # the MXU accumulates in f32.
    x = x_ref[...].astype(jnp.bfloat16)
    h = jnp.dot(x, w1_ref[...], preferred_element_type=jnp.float32)
    h = h + b1_ref[...]                        # (TB, H_PAD) + (1, H_PAD)
    h = jnp.maximum(h, LEAK_FACTOR * h)        # LeakyReLU(0.2)
    # Second Linear has out_features == 1: VPU multiply + lane reduce instead of
    # a degenerate N=1 MXU matmul. Padded hidden lanes have w2 == 0 and b1 == 0.
    o = jnp.sum(h * w2_ref[...], axis=-1, keepdims=True) + b2_ref[...]
    o_ref[...] = o.astype(o_ref.dtype)


def prepare_discriminator_params(w1, b1, w2, b2):
    """One-time preprocessing of PyTorch-layout params (hoisted out of forward).
       w1: (100, 2000), b1: (100,), w2: (1, 100), b2: (1,)"""
    w1_p = jnp.zeros((VOCAB_SIZE, H_PAD), jnp.bfloat16)
    w1_p = w1_p.at[:, :GENERATOR_PARAM].set(
        jnp.asarray(w1, jnp.float32).T.astype(jnp.bfloat16))
    b1_p = jnp.zeros((1, H_PAD), jnp.float32)
    b1_p = b1_p.at[0, :GENERATOR_PARAM].set(jnp.asarray(b1, jnp.float32))
    w2_p = jnp.zeros((1, H_PAD), jnp.float32)
    w2_p = w2_p.at[0, :GENERATOR_PARAM].set(
        jnp.asarray(w2, jnp.float32).reshape(-1))
    b2_p = jnp.asarray(b2, jnp.float32).reshape(1, 1)
    return w1_p, b1_p, w2_p, b2_p


def discriminator_forward(x, params):
    """x: (B, 2000) f32 (or bf16). Returns (B,) f32, matching output.view(-1)."""
    w1_p, b1_p, w2_p, b2_p = params
    B = x.shape[0]
    TB = _pick_tb(B, _tb_max_for_device())
    num_tiles = pl.cdiv(B, TB)

    out = pl.pallas_call(
        _disc_kernel,
        grid=(num_tiles,),
        out_shape=jax.ShapeDtypeStruct((B, 1), jnp.float32),
        in_specs=[
            # x: batch-tiled streaming; full last dim (2000) is legal as a block dim
            pl.BlockSpec((TB, VOCAB_SIZE), lambda i: (i, 0)),
            # weights/biases: constant block index -> resident in VMEM, no re-DMA
            pl.BlockSpec((VOCAB_SIZE, H_PAD), lambda i: (0, 0)),
            pl.BlockSpec((1, H_PAD), lambda i: (0, 0)),
            pl.BlockSpec((1, H_PAD), lambda i: (0, 0)),
            pl.BlockSpec((1, 1), lambda i: (0, 0)),
        ],
        out_specs=pl.BlockSpec((TB, 1), lambda i: (i, 0)),
        compiler_params=pltpu.CompilerParams(
            dimension_semantics=("parallel",),
        ),
    )(x, w1_p, b1_p, w2_p, b2_p)

    return out.reshape(-1)   # view(-1)


def _init_params(key):
    """Deterministic synthetic params with PyTorch nn.Linear-like uniform init
    (PyTorch layout: weight is (out, in))."""
    k1, k2, k3, k4 = jax.random.split(key, 4)
    bound1 = 1.0 / jnp.sqrt(VOCAB_SIZE)
    bound2 = 1.0 / jnp.sqrt(GENERATOR_PARAM)
    w1 = jax.random.uniform(k1, (GENERATOR_PARAM, VOCAB_SIZE),
                            jnp.float32, -bound1, bound1)
    b1 = jax.random.uniform(k2, (GENERATOR_PARAM,), jnp.float32, -bound1, bound1)
    w2 = jax.random.uniform(k3, (1, GENERATOR_PARAM), jnp.float32, -bound2, bound2)
    b2 = jax.random.uniform(k4, (1,), jnp.float32, -bound2, bound2)
    return w1, b1, w2, b2


if __name__ == "__main__":
    key = jax.random.PRNGKey(0)
    k_param, k_x = jax.random.split(key)
    w1, b1, w2, b2 = _init_params(k_param)
    params = prepare_discriminator_params(w1, b1, w2, b2)   # once, at init time

    B = 8
    x = jax.random.normal(k_x, (B, VOCAB_SIZE), jnp.float32)

    out = jax.block_until_ready(discriminator_forward(x, params))

    # Reference in plain JAX with the same bf16 rounding of x/W1 (HIGHEST precision
    # so the comparison isolates the kernel). This matches the kernel's bf16
    # numerics, not an exact-f32 PyTorch forward (drift ~1e-3 at this scale).
    x_r = x.astype(jnp.bfloat16).astype(jnp.float32)
    w1_r = w1.astype(jnp.bfloat16).astype(jnp.float32)
    h_ref = jnp.dot(x_r, w1_r.T, precision=jax.lax.Precision.HIGHEST) + b1
    h_ref = jnp.where(h_ref >= 0, h_ref, LEAK_FACTOR * h_ref)
    ref = (jnp.dot(h_ref, w2.T, precision=jax.lax.Precision.HIGHEST)
           + b2).reshape(-1)

    assert out.shape == (B,)
    assert jnp.allclose(out, ref, atol=2e-3, rtol=2e-3), (
        f"max abs err {jnp.max(jnp.abs(out - ref))}")

    print("KERNEL_OK")
</pallas_src>

<mosaic_0001>
module attributes {stable_mosaic.version = 11 : i64} {
  func.func @_disc_kernel(%arg0: i32, %arg1: memref<8x2000xf32, #tpu.memory_space<vmem>>, %arg2: memref<2000x128xbf16, #tpu.memory_space<vmem>>, %arg3: memref<1x128xf32, #tpu.memory_space<vmem>>, %arg4: memref<1x128xf32, #tpu.memory_space<vmem>>, %arg5: memref<1x1xf32, #tpu.memory_space<vmem>>, %arg6: memref<8x1xf32, #tpu.memory_space<vmem>>) attributes {dimension_semantics = [#tpu.dimension_semantics<parallel>], iteration_bounds = array<i64: 1>, scalar_prefetch = 0 : i64, scratch_operands = 0 : i64, tpu.core_type = #tpu.core_type<tc>, window_params = [{transform_indices = @transform_0, window_bounds = array<i64: 8, 2000>}, {pipeline_mode = #tpu.pipeline_mode<synchronous>, transform_indices = @transform_1, window_bounds = array<i64: 2000, 128>}, {pipeline_mode = #tpu.pipeline_mode<synchronous>, transform_indices = @transform_2, window_bounds = array<i64: 1, 128>}, {pipeline_mode = #tpu.pipeline_mode<synchronous>, transform_indices = @transform_3, window_bounds = array<i64: 1, 128>}, {pipeline_mode = #tpu.pipeline_mode<synchronous>, transform_indices = @transform_4, window_bounds = array<i64: 1, 1>}, {transform_indices = @transform_5, window_bounds = array<i64: 8, 1>}]} {
    %c0 = arith.constant 0 : index
    %c0_0 = arith.constant 0 : index
    %0 = vector.load %arg1[%c0, %c0_0] : memref<8x2000xf32, #tpu.memory_space<vmem>>, vector<8x2000xf32>
    %1 = arith.truncf %0 : vector<8x2000xf32> to vector<8x2000xbf16>
    %c0_1 = arith.constant 0 : index
    %c0_2 = arith.constant 0 : index
    %2 = vector.load %arg2[%c0_1, %c0_2] : memref<2000x128xbf16, #tpu.memory_space<vmem>>, vector<2000x128xbf16>
    %cst = arith.constant dense<0.000000e+00> : vector<8x128xf32>
    %3 = tpu.matmul %1, %2, %cst {dimension_numbers = #tpu.dot_dimension_numbers<[1], [0], [0], [1], [0, 0, 1, 1], [], []>} : vector<8x2000xbf16>, vector<2000x128xbf16>, vector<8x128xf32> -> vector<8x128xf32>
    %c0_3 = arith.constant 0 : index
    %c0_4 = arith.constant 0 : index
    %4 = vector.load %arg3[%c0_3, %c0_4] : memref<1x128xf32, #tpu.memory_space<vmem>>, vector<1x128xf32>
    %5 = vector.broadcast %4 : vector<1x128xf32> to vector<8x128xf32>
    %6 = arith.addf %3, %5 : vector<8x128xf32>
    %cst_5 = arith.constant 2.000000e-01 : f32
    %7 = vector.broadcast %cst_5 : f32 to vector<8x128xf32>
    %8 = arith.mulf %7, %6 : vector<8x128xf32>
    %9 = arith.maximumf %6, %8 : vector<8x128xf32>
    %c0_6 = arith.constant 0 : index
    %c0_7 = arith.constant 0 : index
    %10 = vector.load %arg4[%c0_6, %c0_7] : memref<1x128xf32, #tpu.memory_space<vmem>>, vector<1x128xf32>
    %11 = vector.broadcast %10 : vector<1x128xf32> to vector<8x128xf32>
    %12 = arith.mulf %9, %11 : vector<8x128xf32>
    %cst_8 = arith.constant dense<0.000000e+00> : vector<8xf32>
    %13 = vector.multi_reduction <add>, %12, %cst_8 [1] : vector<8x128xf32> to vector<8xf32>
    %14 = vector.shape_cast %13 : vector<8xf32> to vector<8x1xf32>
    %c0_9 = arith.constant 0 : index
    %c0_10 = arith.constant 0 : index
    %15 = vector.load %arg5[%c0_9, %c0_10] : memref<1x1xf32, #tpu.memory_space<vmem>>, vector<1x1xf32>
    %16 = vector.broadcast %15 : vector<1x1xf32> to vector<8x1xf32>
    %17 = arith.addf %14, %16 : vector<8x1xf32>
    %c0_11 = arith.constant 0 : index
    %c0_12 = arith.constant 0 : index
    %18 = vector.load %arg6[%c0_11, %c0_12] : memref<8x1xf32, #tpu.memory_space<vmem>>, vector<8x1xf32>
    tpu.vector_store %arg6[%c0_11, %c0_12], %17 {strides = array<i32>} : memref<8x1xf32, #tpu.memory_space<vmem>>, vector<8x1xf32>,
    return
  }
  func.func @transform_0(%arg0: i32) -> (i32, i32) {
    %c0_i32 = arith.constant 0 : i32
    %c0_i32_0 = arith.constant 0 : i32
    return %arg0, %c0_i32 : i32, i32
  }
  func.func @transform_1(%arg0: i32) -> (i32, i32) {
    %c0_i32 = arith.constant 0 : i32
    %c0_i32_0 = arith.constant 0 : i32
    %c0_i32_1 = arith.constant 0 : i32
    return %c0_i32, %c0_i32_0 : i32, i32
  }
  func.func @transform_2(%arg0: i32) -> (i32, i32) {
    %c0_i32 = arith.constant 0 : i32
    %c0_i32_0 = arith.constant 0 : i32
    %c0_i32_1 = arith.constant 0 : i32
    return %c0_i32, %c0_i32_0 : i32, i32
  }
  func.func @transform_3(%arg0: i32) -> (i32, i32) {
    %c0_i32 = arith.constant 0 : i32
    %c0_i32_0 = arith.constant 0 : i32
    %c0_i32_1 = arith.constant 0 : i32
    return %c0_i32, %c0_i32_0 : i32, i32
  }
  func.func @transform_4(%arg0: i32) -> (i32, i32) {
    %c0_i32 = arith.constant 0 : i32
    %c0_i32_0 = arith.constant 0 : i32
    %c0_i32_1 = arith.constant 0 : i32
    return %c0_i32, %c0_i32_0 : i32, i32
  }
  func.func @transform_5(%arg0: i32) -> (i32, i32) {
    %c0_i32 = arith.constant 0 : i32
    %c0_i32_0 = arith.constant 0 : i32
    return %arg0, %c0_i32 : i32, i32
  }
}

</mosaic_0001>

<bundles_post_ra>
// kernel: tpu_custom_call.1
= control target key start
LH: loop header
LB: loop body
LE: loop exit
PB: predicated region body
PF: predicated region fallthrough
CT: control target
= control target key end

     0   :  { %s1992_s0 = inlined_call_operand.hbm [shape: f32[8,2000], index: 0, kind: input, shape index: {}]   ;;  %s1993_s1 = inlined_call_operand.hbm [shape: bf16[2000,128], index: 1, kind: input, shape index: {}]   ;;  %s1994_s2 = inlined_call_operand.vmem [shape: f32[1,128], index: 2, kind: input, shape index: {}]   ;;  %s1995_s3 = inlined_call_operand.vmem [shape: f32[1,128], index: 3, kind: input, shape index: {}]   ;;  %s1996_s4 = inlined_call_operand.<no memory space> [shape: f32[1,1], index: 4, kind: input, shape index: {}]   ;;  %s1997_s5 = inlined_call_operand.vmem [shape: f32[8,1], index: 5, kind: output, shape index: {}]  }
   0x1   :  { %v10_v0 = vstv %s1996_s4 }
   0x2   :  { %11 = vst [vmem:[#allocation2] sm:$0x1] %v10_v0 }
   0x3   :  { %12 = vsyncpa [#allocation4], 0 }
   0x4   :  { %13 = vsyncpa [#allocation6], 0  ;;  %s1901_s20 = smov [#allocation3]   ;;  %s1902_s22 = smov [#allocation5]  }
   0x5   :  { %s20_s21 = sshll.u32 %s1901_s20, 4  ;;  %s29_s23 = sshll.u32 %s1902_s22, 4  ;;  %s21_s21 = int_to_ptr.vmem [resolvable:$true] %s20_s21  ;;  %s1939_s23 = int_to_ptr.vmem [resolvable:$true] %s29_s23 }
   0x6   :  { %s1853_s26 = scalar_lea.hbm %s1992_s0, 2048 }
   0x7   :  { %p1854_p0 = scmp.ne.s32.totalorder %s1992_s0, %s1853_s26  ;;  %p1857_p1 = scmp.lt.u32.totalorder %s1853_s26, %s1992_s0 }
   0x9   :  { %p1859_p2 = pnand %p1857_p1, %p1854_p0 }
   0xb   :  { %1862 = shalt.err (!%p1859_p2)
}
   0xc   :  { %s1863_s30 = scalar_lea.vmem %s21_s21, 2048  ;;  %p1868_p4 = scmp.lt.s32.totalorder %s21_s21, %s21_s21 }
   0xd   :  { %p1864_p3 = scmp.ne.s32.totalorder %s21_s21, %s1863_s30  ;;  %p1869_p5 = scmp.lt.s32.totalorder %s1863_s30, %s1863_s30 }
   0xf   :  { %p1870_p6 = por %p1869_p5, %p1868_p4 }
  0x11   :  { %p1871_p7 = pnand %p1870_p6, %p1864_p3 }
  0x13   :  { %1874 = shalt.err (!%p1871_p7)
}
  0x14   :  { %23 = dma.hbm_to_vmem [thread:$0]  %s1992_s0, 2048, %s21_s21, [#allocation4]  }
  0x15   :  { %s1875_s10 = scalar_lea.hbm %s1993_s1, 16000 }
  0x16   :  { %p1876_p8 = scmp.ne.s32.totalorder %s1993_s1, %s1875_s10  ;;  %p1879_p9 = scmp.lt.u32.totalorder %s1875_s10, %s1993_s1 }
  0x18   :  { %p1881_p10 = pnand %p1879_p9, %p1876_p8 }
  0x1a   :  { %1884 = shalt.err (!%p1881_p10)
}
  0x1b   :  { %s1885_s15 = scalar_lea.vmem %s1939_s23, 16000  ;;  %p1890_p12 = scmp.lt.s32.totalorder %s1939_s23, %s1939_s23 }
  0x1c   :  { %p1886_p11 = scmp.ne.s32.totalorder %s1939_s23, %s1885_s15  ;;  %p1891_p13 = scmp.lt.s32.totalorder %s1885_s15, %s1885_s15 }
  0x1e   :  { %p1892_p0 = por %p1891_p13, %p1890_p12 }
  0x20   :  { %p1893_p1 = pnand %p1892_p0, %p1886_p11 }
  0x22   :  { %1896 = shalt.err (!%p1893_p1)
}
  0x23   :  { %s1903_s0 = smov 64   ;;  %s1904_s16 = smov 4  }
  0x24   :  { %35 = dma.hbm_to_vmem [thread:$0]  %s1993_s1, 16000, %s1939_s23, [#allocation6], %s1903_s0, %s1903_s0, %s1904_s16  }
  0x25   :  { %1897 = dma.done.wait [#allocation4], 2048  }
  0x26   :  { %1898 = vsyncadd [#allocation4], 4294965248 }
  0x27   :  { %1899 = dma.done.wait [#allocation6], 16000  }
  0x28   :  { %1900 = vsyncadd [#allocation6], 4294951296  ;;  %v1728_v1 = vld [vmem:[#allocation5 + $0x40] sm:$0xff]   ;;  %v1732_v5 = vld [vmem:[#allocation5 + $0x48] sm:$0xff]   ;;  %vm1088_vm0 = vcmask 654336   ;;  %vm1432_vm1 = vcmask 7168  }
  0x29   :  { %v1729_v2 = vld [vmem:[#allocation5 + $0xc0] sm:$0xff]   ;;  %1569 = vmatprep.subr.bf16.mxu0 %v1728_v1  ;;  %v1733_v6 = vld [vmem:[#allocation5 + $0xc8] sm:$0xff]   ;;  %v1736_v9 = vld [vmem:[#allocation5 + $0x50] sm:$0xff]  }
  0x2a   :  { %v1730_v3 = vld [vmem:[#allocation5] sm:$0xff]   ;;  %1591 = vmatprep.subr.bf16.mxu1 %v1729_v2  ;;  %v1734_v7 = vld [vmem:[#allocation5 + $0x8] sm:$0xff]   ;;  %v1737_v10 = vld [vmem:[#allocation5 + $0xd0] sm:$0xff]  }
  0x2b   :  { %v1731_v4 = vld [vmem:[#allocation5 + $0x80] sm:$0xff]   ;;  %1570 = vmatpush3.bf16.msra.mxu0 %v1730_v3  ;;  %v1735_v8 = vld [vmem:[#allocation5 + $0x88] sm:$0xff]   ;;  %v1738_v11 = vld [vmem:[#allocation5 + $0x10] sm:$0xff]  }
  0x2c   :  { %1592 = vmatpush3.bf16.msra.mxu1 %v1731_v4  ;;  %1571 = vmatprep.subr.bf16.mxu0 %v1732_v5  ;;  %v1739_v12 = vld [vmem:[#allocation5 + $0x90] sm:$0xff]   ;;  %v1740_v13 = vld [vmem:[#allocation5 + $0x58] sm:$0xff]   ;;  %v1744_v17 = vld [vmem:[#allocation5 + $0x60] sm:$0xff]  }
  0x2d   :  { %1593 = vmatprep.subr.bf16.mxu1 %v1733_v6  ;;  %v1741_v14 = vld [vmem:[#allocation5 + $0xd8] sm:$0xff]   ;;  %v1745_v18 = vld [vmem:[#allocation5 + $0xe0] sm:$0xff]   ;;  %v1748_v21 = vld [vmem:[#allocation5 + $0x68] sm:$0xff]  }
  0x2e   :  { %v1742_v15 = vld [vmem:[#allocation5 + $0x18] sm:$0xff]   ;;  %v1746_v19 = vld [vmem:[#allocation5 + $0x20] sm:$0xff]   ;;  %v1749_v22 = vld [vmem:[#allocation5 + $0xe8] sm:$0xff]  }
  0x2f   :  { %1572 = vmatpush3.bf16.msra.mxu0 %v1734_v7  ;;  %v1743_v16 = vld [vmem:[#allocation5 + $0x98] sm:$0xff]   ;;  %v1747_v20 = vld [vmem:[#allocation5 + $0xa0] sm:$0xff]   ;;  %v1750_v23 = vld [vmem:[#allocation5 + $0x28] sm:$0xff]  }
  0x30   :  { %1594 = vmatpush3.bf16.msra.mxu1 %v1735_v8  ;;  %1573 = vmatprep.subr.bf16.mxu0 %v1736_v9  ;;  %v1751_v24 = vld [vmem:[#allocation5 + $0xa8] sm:$0xff]   ;;  %v1752_v25 = vld [vmem:[#allocation5 + $0x70] sm:$0xff]   ;;  %v1756_v29 = vld [vmem:[#allocation5 + $0x78] sm:$0xff]  }
  0x31   :  { %1595 = vmatprep.subr.bf16.mxu1 %v1737_v10  ;;  %v1753_v26 = vld [vmem:[#allocation5 + $0xf0] sm:$0xff]   ;;  %v1757_v30 = vld [vmem:[#allocation5 + $0xf8] sm:$0xff]   ;;  %v50_v33 = vld [vmem:[#allocation3 + $0x8] sm:$0xff] }
  0x32   :  { %v1754_v27 = vld [vmem:[#allocation5 + $0x30] sm:$0xff]   ;;  %v1758_v31 = vld [vmem:[#allocation5 + $0x38] sm:$0xff]   ;;  %v49_v35 = vld [vmem:[#allocation3] sm:$0xff]  ;;  %v66_v36 = vpack.c.bf16 %v50_v33, %v50_v33 }
  0x33   :  { %1574 = vmatpush3.bf16.msra.mxu0 %v1738_v11  ;;  %v1755_v28 = vld [vmem:[#allocation5 + $0xb0] sm:$0xff]   ;;  %v1759_v32 = vld [vmem:[#allocation5 + $0xb8] sm:$0xff]   ;;  %v65_v38 = vpack.c.bf16 %v49_v35, %v49_v35  ;;  %v1760_v41 = vld [vmem:[#allocation5 + $0x140] sm:$0xff]  }
  0x34   :  { %1596 = vmatpush3.bf16.msra.mxu1 %v1739_v12  ;;  %1575 = vmatprep.subr.bf16.mxu0 %v1740_v13  ;;  %v52_v34 = vld [vmem:[#allocation3 + $0x18] sm:$0xff]  ;;  %v51_v39 = vld [vmem:[#allocation3 + $0x10] sm:$0xff]  ;;  %v1761_v42 = vld [vmem:[#allocation5 + $0x1c0] sm:$0xff]  }
  0x35   :  { %1597 = vmatprep.subr.bf16.mxu1 %v1741_v14  ;;  %v68_v37 = vpack.c.bf16 %v52_v34, %v52_v34  ;;  %v67_v40 = vpack.c.bf16 %v51_v39, %v51_v39  ;;  %1124 = vmatprep.mubr.bf16.mxu0 %v66_v36  ;;  %v1762_v43 = vld [vmem:[#allocation5 + $0x100] sm:$0xff]   ;;  %v1764_v45 = vld [vmem:[#allocation5 + $0x148] sm:$0xff]   ;;  %v1768_v49 = vld [vmem:[#allocation5 + $0x150] sm:$0xff]  }
  0x36   :  { %v1763_v44 = vld [vmem:[#allocation5 + $0x180] sm:$0xff]   ;;  %v1765_v46 = vld [vmem:[#allocation5 + $0x1c8] sm:$0xff]   ;;  %v1769_v50 = vld [vmem:[#allocation5 + $0x1d0] sm:$0xff]  }
  0x37   :  { %1576 = vmatpush3.bf16.msra.mxu0 %v1742_v15  ;;  %1164 = vmatprep.mubr.bf16.mxu1 %v68_v37  ;;  %v1766_v47 = vld [vmem:[#allocation5 + $0x108] sm:$0xff]   ;;  %v1770_v51 = vld [vmem:[#allocation5 + $0x110] sm:$0xff]   ;;  %v1772_v53 = vld [vmem:[#allocation5 + $0x158] sm:$0xff]  }
  0x38   :  { %1598 = vmatpush3.bf16.msra.mxu1 %v1743_v16  ;;  %1577 = vmatprep.subr.bf16.mxu0 %v1744_v17  ;;  %v1767_v48 = vld [vmem:[#allocation5 + $0x188] sm:$0xff]   ;;  %v1771_v52 = vld [vmem:[#allocation5 + $0x190] sm:$0xff]   ;;  %v1773_v54 = vld [vmem:[#allocation5 + $0x1d8] sm:$0xff]  }
  0x39   :  { %1599 = vmatprep.subr.bf16.mxu1 %v1745_v18  ;;  %v1774_v55 = vld [vmem:[#allocation5 + $0x118] sm:$0xff]   ;;  %v1776_v57 = vld [vmem:[#allocation5 + $0x160] sm:$0xff]   ;;  %v1780_v61 = vld [vmem:[#allocation5 + $0x168] sm:$0xff]  }
  0x3a   :  { %v1775_v56 = vld [vmem:[#allocation5 + $0x198] sm:$0xff]   ;;  %v1777_v58 = vld [vmem:[#allocation5 + $0x1e0] sm:$0xff]   ;;  %v1781_v62 = vld [vmem:[#allocation5 + $0x1e8] sm:$0xff]  }
  0x3b   :  { %1578 = vmatpush3.bf16.msra.mxu0 %v1746_v19  ;;  %v1778_v59 = vld [vmem:[#allocation5 + $0x120] sm:$0xff]   ;;  %v1782_v63 = vld [vmem:[#allocation5 + $0x128] sm:$0xff]   ;;  %v1784_v1 = vld [vmem:[#allocation5 + $0x170] sm:$0xff]  }
  0x3c   :  { %1600 = vmatpush3.bf16.msra.mxu1 %v1747_v20  ;;  %1579 = vmatprep.subr.bf16.mxu0 %v1748_v21  ;;  %v1779_v60 = vld [vmem:[#allocation5 + $0x1a0] sm:$0xff]   ;;  %v1783_v0 = vld [vmem:[#allocation5 + $0x1a8] sm:$0xff]   ;;  %v1785_v2 = vld [vmem:[#allocation5 + $0x1f0] sm:$0xff]  }
  0x3d   :  { %1601 = vmatprep.subr.bf16.mxu1 %v1749_v22  ;;  %v1786_v3 = vld [vmem:[#allocation5 + $0x130] sm:$0xff]   ;;  %v1788_v5 = vld [vmem:[#allocation5 + $0x178] sm:$0xff]   ;;  %v54_v9 = vld [vmem:[#allocation3 + $0x28] sm:$0xff] }
  0x3e   :  { %v1787_v4 = vld [vmem:[#allocation5 + $0x1b0] sm:$0xff]   ;;  %v1789_v6 = vld [vmem:[#allocation5 + $0x1f8] sm:$0xff]   ;;  %v70_v11 = vpack.c.bf16 %v54_v9, %v54_v9  ;;  %v53_v13 = vld [vmem:[#allocation3 + $0x20] sm:$0xff] }
  0x3f   :  { %1580 = vmatpush3.bf16.msra.mxu0 %v1750_v23  ;;  %v1790_v7 = vld [vmem:[#allocation5 + $0x138] sm:$0xff]   ;;  %v55_v14 = vld [vmem:[#allocation3 + $0x30] sm:$0xff]  ;;  %v69_v15 = vpack.c.bf16 %v53_v13, %v53_v13  ;;  %v1792_v17 = vld [vmem:[#allocation5 + $0x240] sm:$0xff]  }
  0x40   :  { %1602 = vmatpush3.bf16.msra.mxu1 %v1751_v24  ;;  %1581 = vmatprep.subr.bf16.mxu0 %v1752_v25  ;;  %v1791_v8 = vld [vmem:[#allocation5 + $0x1b8] sm:$0xff]   ;;  %v71_v16 = vpack.c.bf16 %v55_v14, %v55_v14  ;;  %v1793_v18 = vld [vmem:[#allocation5 + $0x2c0] sm:$0xff]   ;;  %v1796_v21 = vld [vmem:[#allocation5 + $0x248] sm:$0xff]  }
  0x41   :  { %1603 = vmatprep.subr.bf16.mxu1 %v1753_v26  ;;  %v56_v10 = vld [vmem:[#allocation3 + $0x38] sm:$0xff]  ;;  %v1794_v19 = vld [vmem:[#allocation5 + $0x200] sm:$0xff]   ;;  %v1797_v22 = vld [vmem:[#allocation5 + $0x2c8] sm:$0xff]  }
  0x42   :  { %v72_v12 = vpack.c.bf16 %v56_v10, %v56_v10  ;;  %v1795_v20 = vld [vmem:[#allocation5 + $0x280] sm:$0xff]   ;;  %v1798_v23 = vld [vmem:[#allocation5 + $0x208] sm:$0xff]   ;;  %v1800_v25 = vld [vmem:[#allocation5 + $0x250] sm:$0xff]  }
  0x43   :  { %1582 = vmatpush3.bf16.msra.mxu0 %v1754_v27  ;;  %v1799_v24 = vld [vmem:[#allocation5 + $0x288] sm:$0xff]   ;;  %v1801_v26 = vld [vmem:[#allocation5 + $0x2d0] sm:$0xff]   ;;  %v1808_v33 = vld [vmem:[#allocation5 + $0x260] sm:$0xff]  }
  0x44   :  { %1604 = vmatpush3.bf16.msra.mxu1 %v1755_v28  ;;  %1583 = vmatprep.subr.bf16.mxu0 %v1756_v29  ;;  %v1802_v27 = vld [vmem:[#allocation5 + $0x210] sm:$0xff]   ;;  %v1804_v29 = vld [vmem:[#allocation5 + $0x258] sm:$0xff]   ;;  %v1809_v34 = vld [vmem:[#allocation5 + $0x2e0] sm:$0xff]  }
  0x45   :  { %1605 = vmatprep.subr.bf16.mxu1 %v1757_v30  ;;  %v1803_v28 = vld [vmem:[#allocation5 + $0x290] sm:$0xff]   ;;  %v1805_v30 = vld [vmem:[#allocation5 + $0x2d8] sm:$0xff]   ;;  %v1810_v35 = vld [vmem:[#allocation5 + $0x220] sm:$0xff]  }
  0x46   :  { %v1811_v36 = vld [vmem:[#allocation5 + $0x2a0] sm:$0xff]   ;;  %v1812_v37 = vld [vmem:[#allocation5 + $0x268] sm:$0xff]   ;;  %v1843_v13 = vld [vmem:[#allocation5 + $0x330] sm:$0xff]  }
  0x47   :  { %1584 = vmatpush3.bf16.msra.mxu0 %v1758_v31  ;;  %v1806_v31 = vld [vmem:[#allocation5 + $0x218] sm:$0xff]   ;;  %v1814_v39 = vld [vmem:[#allocation5 + $0x228] sm:$0xff]   ;;  %v1844_v14 = vld [vmem:[#allocation5 + $0x3b0] sm:$0xff]  }
  0x48   :  { %1606 = vmatpush3.bf16.msra.mxu1 %v1759_v32  ;;  %1613 = vmatprep.subr.bf16.mxu0 %v1760_v41  ;;  %v1807_v32 = vld [vmem:[#allocation5 + $0x298] sm:$0xff]   ;;  %v1816_v41 = vld [vmem:[#allocation5 + $0x270] sm:$0xff]   ;;  %v1839_v9 = vld [vmem:[#allocation5 + $0x368] sm:$0xff]  }
  0x49   :  { %1635 = vmatprep.subr.bf16.mxu1 %v1761_v42  ;;  %v1817_v42 = vld [vmem:[#allocation5 + $0x2f0] sm:$0xff]   ;;  %v1840_v10 = vld [vmem:[#allocation5 + $0x328] sm:$0xff]  }
  0x4a   :  { %1125 = vmatmul.mubr.bf16.vlgmr.msra.gmra.mrb[0].mxu0 %v65_v38  ;;  %v1813_v38 = vld [vmem:[#allocation5 + $0x2e8] sm:$0xff]  }
  0x4b   :  { %1165 = vmatmul.mubr.bf16.vlgmr.msra.gmra.mrb[0].mxu1 %v67_v40  ;;  %1614 = vmatpush3.bf16.msra.mxu0 %v1762_v43  ;;  %v1815_v40 = vld [vmem:[#allocation5 + $0x2a8] sm:$0xff]   ;;  %v1818_v43 = vld [vmem:[#allocation5 + $0x230] sm:$0xff]  }
  0x4c   :  { %1636 = vmatpush3.bf16.msra.mxu1 %v1763_v44  ;;  %1615 = vmatprep.subr.bf16.mxu0 %v1764_v45  ;;  %v1819_v44 = vld [vmem:[#allocation5 + $0x2b0] sm:$0xff]   ;;  %v1820_v45 = vld [vmem:[#allocation5 + $0x278] sm:$0xff]  }
  0x4d   :  { %1637 = vmatprep.subr.bf16.mxu1 %v1765_v46  ;;  %1204 = vmatprep.mubr.bf16.mxu0 %v70_v11  ;;  %v1821_v46 = vld [vmem:[#allocation5 + $0x2f8] sm:$0xff]   ;;  %v1841_v11 = vld [vmem:[#allocation5 + $0x3a8] sm:$0xff]  }
  0x4e   :  { %1244 = vmatprep.mubr.bf16.mxu1 %v72_v12  ;;  %v1842_v12 = vld [vmem:[#allocation5 + $0x370] sm:$0xff]  }
  0x4f   :  { %1616 = vmatpush3.bf16.msra.mxu0 %v1766_v47  ;;  %v1822_v47 = vld [vmem:[#allocation5 + $0x238] sm:$0xff]  }
  0x50   :  { %1638 = vmatpush3.bf16.msra.mxu1 %v1767_v48  ;;  %1617 = vmatprep.subr.bf16.mxu0 %v1768_v49  ;;  %v1823_v48 = vld [vmem:[#allocation5 + $0x2b8] sm:$0xff]   ;;  %v58_v49 = vld [vmem:[#allocation3 + $0x48] sm:$0xff] }
  0x51   :  { %1639 = vmatprep.subr.bf16.mxu1 %v1769_v50  ;;  %v74_v50 = vpack.c.bf16 %v58_v49, %v58_v49 }
  0x53   :  { %1618 = vmatpush3.bf16.msra.mxu0 %v1770_v51  ;;  %v60_v51 = vld [vmem:[#allocation3 + $0x58] sm:$0xff] }
  0x54   :  { %1640 = vmatpush3.bf16.msra.mxu1 %v1771_v52  ;;  %1619 = vmatprep.subr.bf16.mxu0 %v1772_v53  ;;  %v57_v52 = vld [vmem:[#allocation3 + $0x40] sm:$0xff]  ;;  %v59_v53 = vld [vmem:[#allocation3 + $0x50] sm:$0xff] }
  0x55   :  { %1641 = vmatprep.subr.bf16.mxu1 %v1773_v54  ;;  %v76_v54 = vpack.c.bf16 %v60_v51, %v60_v51 }
  0x57   :  { %1620 = vmatpush3.bf16.msra.mxu0 %v1774_v55  ;;  %v73_v55 = vpack.c.bf16 %v57_v52, %v57_v52 }
  0x58   :  { %1642 = vmatpush3.bf16.msra.mxu1 %v1775_v56  ;;  %1621 = vmatprep.subr.bf16.mxu0 %v1776_v57  ;;  %v75_v56 = vpack.c.bf16 %v59_v53, %v59_v53  ;;  %v1824_v57 = vld [vmem:[#allocation5 + $0x340] sm:$0xff]  }
  0x59   :  { %1643 = vmatprep.subr.bf16.mxu1 %v1777_v58  ;;  %v1905_v58 = vmov 0  }
  0x5b   :  { %1622 = vmatpush3.bf16.msra.mxu0 %v1778_v59  ;;  %v1825_v59 = vld [vmem:[#allocation5 + $0x300] sm:$0xff]  }
  0x5c   :  { %1644 = vmatpush3.bf16.msra.mxu1 %v1779_v60  ;;  %1623 = vmatprep.subr.bf16.mxu0 %v1780_v61  ;;  %v1826_v60 = vld [vmem:[#allocation5 + $0x380] sm:$0xff]   ;;  %v1827_v61 = vld [vmem:[#allocation5 + $0x348] sm:$0xff]  }
  0x5d   :  { %1645 = vmatprep.subr.bf16.mxu1 %v1781_v62  ;;  %v1828_v62 = vld [vmem:[#allocation5 + $0x308] sm:$0xff]  }
  0x5f   :  { %1624 = vmatpush3.bf16.msra.mxu0 %v1782_v63  ;;  %v1829_v63 = vld [vmem:[#allocation5 + $0x388] sm:$0xff]  }
  0x60   :  { %1646 = vmatpush3.bf16.msra.mxu1 %v1783_v0  ;;  %1625 = vmatprep.subr.bf16.mxu0 %v1784_v1  ;;  %v1830_v0 = vld [vmem:[#allocation5 + $0x350] sm:$0xff]  }
  0x61   :  { %1647 = vmatprep.subr.bf16.mxu1 %v1785_v2  ;;  %v1831_v1 = vld [vmem:[#allocation5 + $0x310] sm:$0xff]  }
  0x62   :  { %v1832_v2 = vld [vmem:[#allocation5 + $0x390] sm:$0xff]  }
  0x63   :  { %1626 = vmatpush3.bf16.msra.mxu0 %v1786_v3  ;;  %v1833_v3 = vld [vmem:[#allocation5 + $0x358] sm:$0xff]  }
  0x64   :  { %1648 = vmatpush3.bf16.msra.mxu1 %v1787_v4  ;;  %1627 = vmatprep.subr.bf16.mxu0 %v1788_v5  ;;  %v1834_v4 = vld [vmem:[#allocation5 + $0x318] sm:$0xff]  }
  0x65   :  { %1649 = vmatprep.subr.bf16.mxu1 %v1789_v6  ;;  %v1835_v5 = vld [vmem:[#allocation5 + $0x398] sm:$0xff]   ;;  %v1836_v6 = vld [vmem:[#allocation5 + $0x360] sm:$0xff]  }
  0x67   :  { %1628 = vmatpush3.bf16.msra.mxu0 %v1790_v7  ;;  %v1837_v7 = vld [vmem:[#allocation5 + $0x320] sm:$0xff]  }
  0x68   :  { %1650 = vmatpush3.bf16.msra.mxu1 %v1791_v8  ;;  %1657 = vmatprep.subr.bf16.mxu0 %v1792_v17  ;;  %v1838_v8 = vld [vmem:[#allocation5 + $0x3a0] sm:$0xff]  }
  0x69   :  { %1679 = vmatprep.subr.bf16.mxu1 %v1793_v18  ;;  %v1846_v18 = vld [vmem:[#allocation5 + $0x338] sm:$0xff]  }
  0x6a   :  { %1205 = vmatmul.mubr.bf16.vlgmr.msra.gmra.mrb[4].mxu0 %v69_v15  ;;  %v62_v15 = vld [vmem:[#allocation3 + $0x68] sm:$0xff] }
  0x6b   :  { %1245 = vmatmul.mubr.bf16.vlgmr.msra.gmra.mrb[4].mxu1 %v71_v16  ;;  %1658 = vmatpush3.bf16.msra.mxu0 %v1794_v19  ;;  %v1845_v16 = vld [vmem:[#allocation5 + $0x378] sm:$0xff]   ;;  %v78_v17 = vpack.c.bf16 %v62_v15, %v62_v15 }
  0x6c   :  { %1680 = vmatpush3.bf16.msra.mxu1 %v1795_v20  ;;  %1659 = vmatprep.subr.bf16.mxu0 %v1796_v21  ;;  %v1847_v19 = vld [vmem:[#allocation5 + $0x3b8] sm:$0xff]   ;;  %v61_v20 = vld [vmem:[#allocation3 + $0x60] sm:$0xff] }
  0x6d   :  { %1681 = vmatprep.subr.bf16.mxu1 %v1797_v22  ;;  %1284 = vmatprep.mubr.bf16.mxu0 %v74_v50  ;;  %v64_v21 = vld [vmem:[#allocation3 + $0x78] sm:$0xff] }
  0x6e   :  { %1324 = vmatprep.mubr.bf16.mxu1 %v76_v54  ;;  %v80_v22 = vpack.c.bf16 %v64_v21, %v64_v21 }
  0x6f   :  { %1660 = vmatpush3.bf16.msra.mxu0 %v1798_v23  ;;  %v77_v23 = vpack.c.bf16 %v61_v20, %v61_v20 }
  0x70   :  { %1682 = vmatpush3.bf16.msra.mxu1 %v1799_v24  ;;  %1661 = vmatprep.subr.bf16.mxu0 %v1800_v25  ;;  %v1848_v24 = vld [vmem:[#allocation5 + $0x3c0] sm:$0xff]   ;;  %v1849_v25 = vld [vmem:[#allocation5 + $0x3c8] sm:$0xff]  }
  0x71   :  { %1683 = vmatprep.subr.bf16.mxu1 %v1801_v26  ;;  %v1850_v26 = vld [vmem:[#allocation5 + $0x3d0] sm:$0xff]  }
  0x73   :  { %1662 = vmatpush3.bf16.msra.mxu0 %v1802_v27  ;;  %v1851_v27 = vld [vmem:[#allocation5 + $0x3d8] sm:$0xff]  }
  0x74   :  { %1684 = vmatpush3.bf16.msra.mxu1 %v1803_v28  ;;  %1663 = vmatprep.subr.bf16.mxu0 %v1804_v29  ;;  %v1852_v28 = vld [vmem:[#allocation5 + $0x3e0] sm:$0xff]   ;;  %v63_v29 = vld [vmem:[#allocation3 + $0x70] sm:$0xff] }
  0x75   :  { %1685 = vmatprep.subr.bf16.mxu1 %v1805_v30  ;;  %v79_v30 = vpack.c.bf16 %v63_v29, %v63_v29 }
  0x77   :  { %1664 = vmatpush3.bf16.msra.mxu0 %v1806_v31 }
  0x78   :  { %1686 = vmatpush3.bf16.msra.mxu1 %v1807_v32  ;;  %1665 = vmatprep.subr.bf16.mxu0 %v1808_v33  ;;  %v1440_v33 = vld [vmem:[%s1994_s2] ss:$0 sm:$0xff] }
  0x79   :  { %1687 = vmatprep.subr.bf16.mxu1 %v1809_v34 }
  0x7b   :  { %1666 = vmatpush3.bf16.msra.mxu0 %v1810_v35 }
  0x7c   :  { %1688 = vmatpush3.bf16.msra.mxu1 %v1811_v36  ;;  %1667 = vmatprep.subr.bf16.mxu0 %v1812_v37 }
  0x7d   :  { %1689 = vmatprep.subr.bf16.mxu1 %v1813_v38 }
  0x7f   :  { %1668 = vmatpush3.bf16.msra.mxu0 %v1814_v39 }
  0x80   :  { %1690 = vmatpush3.bf16.msra.mxu1 %v1815_v40  ;;  %1669 = vmatprep.subr.bf16.mxu0 %v1816_v41 }
  0x81   :  { %1691 = vmatprep.subr.bf16.mxu1 %v1817_v42 }
  0x83   :  { %1670 = vmatpush3.bf16.msra.mxu0 %v1818_v43 }
  0x84   :  { %1692 = vmatpush3.bf16.msra.mxu1 %v1819_v44  ;;  %1671 = vmatprep.subr.bf16.mxu0 %v1820_v45 }
  0x85   :  { %1693 = vmatprep.subr.bf16.mxu1 %v1821_v46 }
  0x87   :  { %1672 = vmatpush3.bf16.msra.mxu0 %v1822_v47 }
  0x88   :  { %1694 = vmatpush3.bf16.msra.mxu1 %v1823_v48  ;;  %1701 = vmatprep.subr.bf16.mxu0 %v1824_v57 }
  0x89   :  { %1372 = vmatprep.subr.bf16.mxu1 %v1905_v58 }
  0x8a   :  { %1285 = vmatmul.mubr.bf16.vlgmr.msra.gmra.mrb[8].mxu0 %v73_v55 }
  0x8b   :  { %1325 = vmatmul.mubr.bf16.vlgmr.msra.gmra.mrb[8].mxu1 %v75_v56  ;;  %1702 = vmatpush3.bf16.msra.mxu0 %v1825_v59 }
  0x8c   :  { %1373 = vmatpush1.bf16.msra.mxu1 %v1826_v60  ;;  %1703 = vmatprep.subr.bf16.mxu0 %v1827_v61 }
  0x8d   :  { %1374 = vmatprep.subr.bf16.mxu1 %v1905_v58  ;;  %1364 = vmatprep.mubr.bf16.mxu0 %v78_v17 }
  0x8e   :  { %1566 = vmatprep.mubr.msk.bf16.mxu1 %vm1088_vm0, %v80_v22 }
  0x8f   :  { %1704 = vmatpush3.bf16.msra.mxu0 %v1828_v62 }
  0x90   :  { %1375 = vmatpush1.bf16.msra.mxu1 %v1829_v63  ;;  %1705 = vmatprep.subr.bf16.mxu0 %v1830_v0 }
  0x91   :  { %1376 = vmatprep.subr.bf16.mxu1 %v1905_v58 }
  0x93   :  { %1706 = vmatpush3.bf16.msra.mxu0 %v1831_v1 }
  0x94   :  { %1377 = vmatpush1.bf16.msra.mxu1 %v1832_v2  ;;  %1707 = vmatprep.subr.bf16.mxu0 %v1833_v3 }
  0x95   :  { %1378 = vmatprep.subr.bf16.mxu1 %v1905_v58 }
  0x97   :  { %1708 = vmatpush3.bf16.msra.mxu0 %v1834_v4 }
  0x98   :  { %1379 = vmatpush1.bf16.msra.mxu1 %v1835_v5  ;;  %1709 = vmatprep.subr.bf16.mxu0 %v1836_v6 }
  0x99   :  { %1380 = vmatprep.subr.bf16.mxu1 %v1905_v58 }
  0x9b   :  { %1710 = vmatpush3.bf16.msra.mxu0 %v1837_v7 }
  0x9c   :  { %1381 = vmatpush1.bf16.msra.mxu1 %v1838_v8  ;;  %1711 = vmatprep.subr.bf16.mxu0 %v1839_v9 }
  0x9d   :  { %1382 = vmatprep.subr.bf16.mxu1 %v1905_v58 }
  0x9f   :  { %1712 = vmatpush3.bf16.msra.mxu0 %v1840_v10 }
  0xa0   :  { %1383 = vmatpush1.bf16.msra.mxu1 %v1841_v11  ;;  %1713 = vmatprep.subr.bf16.mxu0 %v1842_v12 }
  0xa1   :  { %1384 = vmatprep.subr.bf16.mxu1 %v1905_v58 }
  0xa3   :  { %1714 = vmatpush3.bf16.msra.mxu0 %v1843_v13 }
  0xa4   :  { %1385 = vmatpush1.bf16.msra.mxu1 %v1844_v14  ;;  %1715 = vmatprep.subr.bf16.mxu0 %v1845_v16  ;;  %v1567_v16 = vld [vmem:[%s1995_s3] ss:$0 sm:$0xff] }
  0xa5   :  { %1386 = vmatprep.subr.bf16.mxu1 %v1905_v58 }
  0xa7   :  { %1716 = vmatpush3.bf16.msra.mxu0 %v1846_v18 }
  0xa8   :  { %1387 = vmatpush1.bf16.msra.mxu1 %v1847_v19  ;;  %v1568_v19 = vld [vmem:[#allocation2] ss:$0 sm:$0xff] }
  0xa9   :  { %1388 = vmatprep.subr.bf16.mxu1 %v1905_v58 }
  0xaa   :  { %1365 = vmatmul.mubr.bf16.vlgmr.msra.gmra.mrb[12].mxu0 %v77_v23 }
  0xac   :  { %1389 = vmatpush1.bf16.msra.mxu1 %v1848_v24 }
  0xad   :  { %1390 = vmatprep.subr.bf16.mxu1 %v1905_v58 }
  0xb0   :  { %1391 = vmatpush1.bf16.msra.mxu1 %v1849_v25 }
  0xb1   :  { %1392 = vmatprep.subr.bf16.mxu1 %v1905_v58 }
  0xb4   :  { %1393 = vmatpush1.bf16.msra.mxu1 %v1850_v26 }
  0xb5   :  { %1394 = vmatprep.subr.bf16.mxu1 %v1905_v58 }
  0xb8   :  { %1395 = vmatpush1.bf16.msra.mxu1 %v1851_v27 }
  0xb9   :  { %1396 = vmatprep.subr.bf16.mxu1 %v1905_v58 }
  0xbc   :  { %1397 = vmatpush1.bf16.msra.mxu1 %v1852_v28 }
  0xbf   :  { %1405 = vmatmul.mubr.bf16.vlgmr.msra.gmra.mrb[12].mxu1 %v79_v30 }
 0x11d   :  { %v1585_v31 = vpop.f32.mrb[0].mxu0 }
 0x11e   :  { %v1607_v32 = vpop.f32.mrb[0].mxu1  ;;  %v1586_v34 = vpop.f32.mrb[1].mxu0 }
 0x11f   :  { %v1608_v35 = vpop.f32.mrb[1].mxu1  ;;  %v1587_v36 = vadd.f32 %v1586_v34, %v1585_v31  ;;  %v1588_v39 = vpop.f32.mrb[2].mxu0 }
 0x120   :  { %v1609_v37 = vadd.f32 %v1608_v35, %v1607_v32  ;;  %v1610_v38 = vpop.f32.mrb[2].mxu1  ;;  %v1589_v41 = vpop.f32.mrb[3].mxu0 }
 0x121   :  { %v1611_v40 = vpop.f32.mrb[3].mxu1  ;;  %v1127_v42 = vadd.f32 %v1587_v36, %v1440_v33 }
 0x123   :  { %v1167_v43 = vadd.f32 %v1609_v37, %v1127_v42 }
 0x13d   :  { %v1629_v44 = vpop.f32.mrb[4].mxu0 }
 0x13e   :  { %v1651_v45 = vpop.f32.mrb[4].mxu1  ;;  %v1630_v46 = vpop.f32.mrb[5].mxu0 }
 0x13f   :  { %v1631_v47 = vadd.f32 %v1630_v46, %v1629_v44  ;;  %v1652_v48 = vpop.f32.mrb[5].mxu1  ;;  %v1632_v49 = vpop.f32.mrb[6].mxu0 }
 0x140   :  { %v1653_v50 = vadd.f32 %v1652_v48, %v1651_v45  ;;  %v1654_v51 = vpop.f32.mrb[6].mxu1  ;;  %v1633_v52 = vpop.f32.mrb[7].mxu0 }
 0x141   :  { %v1207_v53 = vadd.f32 %v1631_v47, %v1167_v43  ;;  %v1655_v54 = vpop.f32.mrb[7].mxu1 }
 0x143   :  { %v1247_v55 = vadd.f32 %v1653_v50, %v1207_v53 }
 0x15d   :  { %v1673_v56 = vpop.f32.mrb[8].mxu0 }
 0x15e   :  { %v1695_v57 = vpop.f32.mrb[8].mxu1  ;;  %v1674_v58 = vpop.f32.mrb[9].mxu0 }
 0x15f   :  { %v1675_v59 = vadd.f32 %v1674_v58, %v1673_v56  ;;  %v1696_v60 = vpop.f32.mrb[9].mxu1  ;;  %v1676_v61 = vpop.f32.mrb[10].mxu0 }
 0x160   :  { %v1697_v62 = vadd.f32 %v1696_v60, %v1695_v57  ;;  %v1698_v63 = vpop.f32.mrb[10].mxu1  ;;  %v1677_v0 = vpop.f32.mrb[11].mxu0 }
 0x161   :  { %v1287_v1 = vadd.f32 %v1675_v59, %v1247_v55  ;;  %v1699_v2 = vpop.f32.mrb[11].mxu1 }
 0x163   :  { %v1327_v3 = vadd.f32 %v1697_v62, %v1287_v1 }
 0x17d   :  { %v1717_v4 = vpop.f32.mrb[12].mxu0 }
 0x17e   :  { %v1718_v5 = vpop.f32.mrb[13].mxu0 }
 0x17f   :  { %v1719_v6 = vadd.f32 %v1718_v5, %v1717_v4  ;;  %v1720_v7 = vpop.f32.mrb[14].mxu0 }
 0x180   :  { %v1721_v8 = vpop.f32.mrb[15].mxu0 }
 0x181   :  { %v1367_v9 = vadd.f32 %v1719_v6, %v1327_v3 }
 0x192   :  { %v1406_v10 = vpop.f32.mrb[12].mxu1 }
 0x193   :  { %v1407_v11 = vadd.f32 %v1406_v10, %v1367_v9  ;;  %v1408_v12 = vpop.f32.mrb[13].mxu1 }
 0x194   :  { %v1409_v13 = vpop.f32.mrb[14].mxu1 }
 0x195   :  { %v1412_v14 = vmul.f32 0.2, %v1407_v11  ;;  %v1410_v15 = vpop.f32.mrb[15].mxu1 }
 0x197   :  { %v1413_v17 = vmax.f32 %v1407_v11, %v1412_v14 }
 0x199   :  { %v1421_v18 = vmul.f32 %v1567_v16, %v1413_v17 }
 0x19b   :  { %1422 = vadd.xlane.f32.xlu0 %v1421_v18 }
 0x228   :  { %v1423_v20 = vpop.xlane.xlu0 %1422 }
 0x229   :  { %v1431_v21 = vadd.f32 %v1568_v19, %v1423_v20 }
 0x22b   :  { %1433 = vst.msk [vmem:[%s1997_s5] sm:$0xff] %vm1432_vm1, %v1431_v21 }
 0x22c   :  { %1438 = vsyncpa [#allocation4], 1 }
 0x22d   :  { %1439 = vsyncpa [#allocation6], 1 }

</bundles_post_ra>
